<compile_context>
chip_gen: v7x
topology: tpu7x:2x2x1
jax: 0.10.0
libtpu: 0.0.40
codegen_flags: <defaults>
</compile_context>

<pallas_src>
import functools

import jax
import jax.numpy as jnp
import numpy as np
from jax import lax
from jax.experimental import pallas as pl
from jax.experimental.pallas import tpu as pltpu

NLANE = 128            # lane-dense packed-output width (one full vreg lane dimension)
PRED_LANE = NLANE - 2  # argmax prediction (stored as f32; exact for num_classes < 2**24)
NLL_LANE = NLANE - 1   # per-row cross-entropy


def _round_up(x, m):
    return ((x + m - 1) // m) * m


# --------------------------------------------------------------------------------------
# Kernel
# --------------------------------------------------------------------------------------
def _logreg_kernel(ids_ref, emb_ref, wt_ref, b_ref, g_ref, beta_ref, lbl_ref,
                   out_ref, *, num_classes, seq_len, vocab_tile):
    # Shapes (per grid step / batch tile):
    #   ids_ref  : (B*S, 1) int32   flattened token ids (B = padded batch tile)
    #   emb_ref  : (Vp, D)  bf16    embedding table (rows zero-padded to a vocab_tile mult)
    #   wt_ref   : (D, 128) bf16    fc weight^T, pre-scaled by 1/S, zero-padded to 128 lanes
    #   b_/g_/beta_ref : (1, 128) f32  bias / ln gamma / ln beta, zero-padded
    #   lbl_ref  : (B, 1)   int32   labels
    #   out_ref  : (B, 128) f32     packed: [:, :C]=logits, [:,126]=pred, [:,127]=nll
    C = num_classes
    S = seq_len
    VT = vocab_tile
    B = lbl_ref.shape[0]
    BS = ids_ref.shape[0]          # == B * S
    Vp, D = emb_ref.shape
    NL = out_ref.shape[-1]
    n_vtiles = Vp // VT

    ids_col = ids_ref[...]                                                # (BS, 1) int32

    # ---- per-token embedding lookup: V-tiled one-hot @ embed on the MXU, f32 accum ----
    # never materializes a (BS, Vp) iota/one-hot; only one (BS, VT) tile at a time.
    lane_v = lax.broadcasted_iota(jnp.int32, (BS, VT), 1)

    def vtile_body(t, acc):
        off = pl.multiple_of(t * VT, VT)
        onehot_t = (ids_col == (lane_v + off)).astype(jnp.bfloat16)       # (BS, VT) exact 0/1
        emb_t = emb_ref[pl.ds(off, VT), :]                                # (VT, D) bf16
        return acc + jnp.dot(onehot_t, emb_t, preferred_element_type=jnp.float32)

    tok_emb = lax.fori_loop(0, n_vtiles, vtile_body,
                            jnp.zeros((BS, D), jnp.float32), unroll=True)  # (BS, D) f32

    # ---- seq-sum via a (B, BS) 0/1 segment matmul (B is the per-tile batch, so this is
    #      linear in total batch); the 1/S mean factor is folded into wt_ref. ----
    tok = lax.broadcasted_iota(jnp.int32, (B, BS), 1)
    row_start = lax.broadcasted_iota(jnp.int32, (B, BS), 0) * S
    seg = ((tok >= row_start) & (tok < row_start + S)).astype(jnp.bfloat16)  # (B, BS)
    # tok_emb values are exact bf16 numbers (one-hot selection), so this cast is lossless.
    sum_emb = jnp.dot(seg, tok_emb.astype(jnp.bfloat16),
                      preferred_element_type=jnp.float32)                 # (B, D) f32

    # ---- fc: mean_emb @ W^T + b   (wt_ref = W^T / S, zero-padded -> lane-dense result) ----
    logits = jnp.dot(sum_emb.astype(jnp.bfloat16), wt_ref[...],
                     preferred_element_type=jnp.float32) + b_ref[...]     # (B, NL)

    lane = lax.broadcasted_iota(jnp.int32, (B, NL), 1)
    valid = lane < C

    # ---- LayerNorm over the C real lanes only (eps=1e-5, biased variance, affine) ----
    mu = jnp.sum(jnp.where(valid, logits, 0.0), axis=-1, keepdims=True) / C
    diff = jnp.where(valid, logits - mu, 0.0)
    var = jnp.sum(diff * diff, axis=-1, keepdims=True) / C
    x = (logits - mu) * lax.rsqrt(var + 1e-5)
    x = x * g_ref[...] + beta_ref[...]       # padded lanes -> 0 (gamma/beta zero-padded)

    # ---- argmax (first maximal index) and per-row CE, padded lanes masked off ----
    neg = jnp.float32(-1e30)
    xm = jnp.where(valid, x, neg)
    xmax = jnp.max(xm, axis=-1, keepdims=True)                            # (B, 1)
    pred = jnp.min(jnp.where(xm == xmax, lane, NL), axis=-1, keepdims=True)  # (B, 1) int32
    lse = xmax + jnp.log(jnp.sum(jnp.exp(xm - xmax), axis=-1, keepdims=True))
    picked = jnp.sum(jnp.where(lane == lbl_ref[...], x, 0.0), axis=-1, keepdims=True)
    nll = lse - picked                                                    # (B, 1)

    # ---- pack everything into one lane-dense slab -> single unmasked full-width store ----
    out = jnp.where(lane == NL - 2, pred.astype(jnp.float32),
                    jnp.where(lane == NL - 1, nll, x))
    out_ref[...] = out


# --------------------------------------------------------------------------------------
# One-time parameter preparation (hoisted out of the per-step path)
# --------------------------------------------------------------------------------------
def prepare_params(params, seq_len, vocab_tile=None):
    V, D = params["embed"].shape
    C = params["fc_b"].shape[0]
    assert 0 < C <= NLANE - 2, "num_classes must fit the packed 128-lane output slab"
    if vocab_tile is None:
        vocab_tile = min(512, _round_up(V, 128))
    Vp = _round_up(V, vocab_tile)

    emb = jnp.zeros((Vp, D), jnp.bfloat16).at[:V, :].set(
        params["embed"].astype(jnp.bfloat16))
    # fc weight^T scaled by 1/seq_len (folds the seq-mean into the matmul), 128-lane padded.
    wt = jnp.zeros((D, NLANE), jnp.bfloat16).at[:, :C].set(
        (params["fc_w"].T / float(seq_len)).astype(jnp.bfloat16))
    bias = jnp.zeros((1, NLANE), jnp.float32).at[:, :C].set(
        params["fc_b"].astype(jnp.float32))
    gamma = jnp.zeros((1, NLANE), jnp.float32).at[:, :C].set(
        params["ln_g"].astype(jnp.float32))
    beta = jnp.zeros((1, NLANE), jnp.float32).at[:, :C].set(
        params["ln_b"].astype(jnp.float32))

    return {"emb": emb, "wt": wt, "b": bias, "g": gamma, "beta": beta,
            "num_classes": int(C), "seq_len": int(seq_len), "vocab_tile": int(vocab_tile)}


# --------------------------------------------------------------------------------------
# Wrapper
# --------------------------------------------------------------------------------------
def _num_tensorcores_per_chip():
    try:
        kind = jax.devices()[0].device_kind.lower()
        if "v7" in kind:
            return 2
    except Exception:
        pass
    return 1


def _pad2d_bytes(rows, cols, itemsize):
    sub = 8 if itemsize >= 4 else 16
    return _round_up(max(rows, 1), sub) * _round_up(max(cols, 1), 128) * itemsize


def _vmem_limit_bytes(tb, S, Vp, D, vt):
    bs = tb * S
    io = 2 * (_pad2d_bytes(bs, 1, 4) + _pad2d_bytes(tb, 1, 4) + _pad2d_bytes(tb, NLANE, 4))
    par = (_pad2d_bytes(Vp, D, 2) + _pad2d_bytes(D, NLANE, 2) + 3 * _pad2d_bytes(1, NLANE, 4))
    interm = (_pad2d_bytes(bs, vt, 4) + _pad2d_bytes(bs, vt, 2)       # vocab-tile iota + one-hot
              + 2 * _pad2d_bytes(bs, D, 4)                            # tok_emb accumulator
              + _pad2d_bytes(tb, bs, 4) + _pad2d_bytes(tb, bs, 2)     # seg iota + seg
              + 8 * _pad2d_bytes(tb, NLANE, 4))                       # post-fc slabs
    est = io + par + interm
    return int(min(max(2 * est, 8 << 20), 32 << 20))


def logistic_regression_forward(word_ids, label_ids, prepared, *, batch_tile=None):
    B, S = word_ids.shape
    assert S == prepared["seq_len"], "prepared params were built for a different seq_len"
    C = prepared["num_classes"]
    VT = prepared["vocab_tile"]
    Vp, D = prepared["emb"].shape

    # Batch grid only where it pays: v7x has 2 TensorCores/chip, so shard batch tiles across
    # them ("parallel"); on v5e/v6e (1 TC) a grid only adds per-step overhead -> single shot.
    if batch_tile is None:
        batch_tile = 16 if (_num_tensorcores_per_chip() >= 2 and B > 16) else 0

    if batch_tile:
        assert batch_tile % 8 == 0, "batch_tile must be a multiple of 8 sublanes"
        B_pad = _round_up(max(B, batch_tile), batch_tile)
        tb = batch_tile
    else:
        B_pad = max(16, _round_up(B, 16))   # >=16 rows -> full bf16 (16,128) sublane tiles
        tb = B_pad

    # Per-call data prep is only the cheap int32 id/label padding (params are pre-built).
    pad = B_pad - B
    ids = jnp.pad(word_ids.astype(jnp.int32), ((0, pad), (0, 0)))
    lbl = jnp.pad(label_ids.astype(jnp.int32), ((0, pad),)).reshape(B_pad, 1)
    ids_flat = ids.reshape(B_pad * S, 1)

    kernel = functools.partial(_logreg_kernel, num_classes=C, seq_len=S, vocab_tile=VT)
    out_shape = jax.ShapeDtypeStruct((B_pad, NLANE), jnp.float32)
    vmem_limit = _vmem_limit_bytes(tb, S, Vp, D, VT)

    if batch_tile:
        grid_spec = pltpu.PrefetchScalarGridSpec(
            num_scalar_prefetch=0,
            grid=(B_pad // tb,),
            in_specs=[
                pl.BlockSpec((tb * S, 1), lambda i: (i, 0)),   # ids tile
                pl.BlockSpec((Vp, D), lambda i: (0, 0)),       # embed table (resident)
                pl.BlockSpec((D, NLANE), lambda i: (0, 0)),    # fc weight^T / S
                pl.BlockSpec((1, NLANE), lambda i: (0, 0)),    # fc bias
                pl.BlockSpec((1, NLANE), lambda i: (0, 0)),    # ln gamma
                pl.BlockSpec((1, NLANE), lambda i: (0, 0)),    # ln beta
                pl.BlockSpec((tb, 1), lambda i: (i, 0)),       # labels tile
            ],
            out_specs=pl.BlockSpec((tb, NLANE), lambda i: (i, 0)),
        )
        out = pl.pallas_call(
            kernel,
            out_shape=out_shape,
            grid_spec=grid_spec,
            compiler_params=pltpu.CompilerParams(
                dimension_semantics=("parallel",),
                vmem_limit_bytes=vmem_limit),
        )(ids_flat, prepared["emb"], prepared["wt"], prepared["b"],
          prepared["g"], prepared["beta"], lbl)
    else:
        vmem = pl.BlockSpec(memory_space=pltpu.MemorySpace.VMEM)
        out = pl.pallas_call(
            kernel,
            out_shape=out_shape,
            in_specs=[vmem] * 7,
            out_specs=vmem,
            compiler_params=pltpu.CompilerParams(vmem_limit_bytes=vmem_limit),
        )(ids_flat, prepared["emb"], prepared["wt"], prepared["b"],
          prepared["g"], prepared["beta"], lbl)

    logits = out[:B, :C]
    preds = out[:B, PRED_LANE].astype(jnp.int32)
    loss = jnp.mean(out[:B, NLL_LANE])
    return loss, logits, preds


# --------------------------------------------------------------------------------------
# Pure-JAX f32 reference matching the PyTorch forward
# --------------------------------------------------------------------------------------
def reference_forward(word_ids, label_ids, params):
    x = params["embed"][word_ids]                        # (B, S, D)
    x = jnp.mean(x, axis=1)                              # mean over seq
    x = x @ params["fc_w"].T + params["fc_b"]
    mu = jnp.mean(x, -1, keepdims=True)
    var = jnp.mean((x - mu) ** 2, -1, keepdims=True)
    x = (x - mu) / jnp.sqrt(var + 1e-5) * params["ln_g"] + params["ln_b"]
    logp = x - jax.scipy.special.logsumexp(x, axis=-1, keepdims=True)
    loss = -jnp.mean(logp[jnp.arange(x.shape[0]), label_ids])
    return loss, x, jnp.argmax(x, axis=-1)


def _check(word_ids, label_ids, params, loss, logits, preds, atol=5e-2):
    B = word_ids.shape[0]
    klogits = np.asarray(logits)
    kpreds = np.asarray(preds)
    kloss = float(loss)
    lbl_np = np.asarray(label_ids)

    # self-consistency: kernel argmax / CE vs. the kernel's own logits
    kmax = klogits.max(-1, keepdims=True)
    lse = kmax[:, 0] + np.log(np.exp(klogits - kmax).sum(-1))
    self_loss = float(np.mean(lse - klogits[np.arange(B), lbl_np]))
    assert abs(kloss - self_loss) < 1e-4
    assert np.array_equal(kpreds, np.argmax(klogits, axis=-1))

    # vs f32 reference (kernel uses bf16 MXU inputs with f32 accumulation)
    ref_loss, ref_logits, ref_preds = reference_forward(word_ids, label_ids, params)
    ref_logits = np.asarray(ref_logits)
    assert np.allclose(klogits, ref_logits, atol=atol, rtol=atol)
    assert np.allclose(kloss, float(ref_loss), atol=atol, rtol=atol)
    srt = np.sort(ref_logits, axis=-1)
    clear = (srt[:, -1] - srt[:, -2]) > 0.1
    assert np.array_equal(kpreds[clear], np.asarray(ref_preds)[clear])


if __name__ == "__main__":
    B, S = 8, 16          # batch, seq_len
    V, D, C = 128, 32, 8  # vocab_len, embed_dim, num_classes

    key = jax.random.PRNGKey(0)
    k_emb, k_w, k_b, k_ids, k_lbl, k_ids2, k_lbl2 = jax.random.split(key, 7)
    params = {
        "embed": jax.random.normal(k_emb, (V, D), jnp.float32) * 0.1,
        "fc_w":  jax.random.normal(k_w, (C, D), jnp.float32) * 0.1,
        "fc_b":  jax.random.normal(k_b, (C,), jnp.float32) * 0.1,
        "ln_g":  jnp.ones((C,), jnp.float32),
        "ln_b":  jnp.zeros((C,), jnp.float32),
    }
    # One-time parameter prep (cast / pad / 1/S fold) hoisted out of the per-step path.
    prepared = prepare_params(params, seq_len=S)

    # --- run 1: default path (single-shot, no grid on v5e/v6e) ---
    word_ids = jax.random.randint(k_ids, (B, S), 0, V, dtype=jnp.int32)
    label_ids = jax.random.randint(k_lbl, (B,), 0, C, dtype=jnp.int32)
    loss, logits, preds = logistic_regression_forward(word_ids, label_ids, prepared)
    jax.block_until_ready((loss, logits, preds))
    _check(word_ids, label_ids, params, loss, logits, preds)

    # --- run 2: batch-tiled parallel grid path (the one auto-selected on v7x) ---
    B2 = 20
    word_ids2 = jax.random.randint(k_ids2, (B2, S), 0, V, dtype=jnp.int32)
    label_ids2 = jax.random.randint(k_lbl2, (B2,), 0, C, dtype=jnp.int32)
    loss2, logits2, preds2 = logistic_regression_forward(
        word_ids2, label_ids2, prepared, batch_tile=16)
    jax.block_until_ready((loss2, logits2, preds2))
    _check(word_ids2, label_ids2, params, loss2, logits2, preds2)

    print("KERNEL_OK")
</pallas_src>

<mosaic_0001>
module attributes {stable_mosaic.version = 11 : i64} {
  func.func @_logreg_kernel(%arg0: memref<256x1xi32, #tpu.memory_space<vmem>>, %arg1: memref<128x32xbf16, #tpu.memory_space<vmem>>, %arg2: memref<32x128xbf16, #tpu.memory_space<vmem>>, %arg3: memref<1x128xf32, #tpu.memory_space<vmem>>, %arg4: memref<1x128xf32, #tpu.memory_space<vmem>>, %arg5: memref<1x128xf32, #tpu.memory_space<vmem>>, %arg6: memref<16x1xi32, #tpu.memory_space<vmem>>, %arg7: memref<16x128xf32, #tpu.memory_space<vmem>>) attributes {dimension_semantics = [], scalar_prefetch = 0 : i64, scratch_operands = 0 : i64, tpu.core_type = #tpu.core_type<tc>} {
    %c0 = arith.constant 0 : index
    %c0_0 = arith.constant 0 : index
    %0 = vector.load %arg0[%c0, %c0_0] : memref<256x1xi32, #tpu.memory_space<vmem>>, vector<256x1xi32>
    %1 = tpu.iota {dimensions = array<i32: 1>} : vector<256x128xi32>
    %cst = arith.constant 0.000000e+00 : f32
    %2 = vector.broadcast %cst : f32 to vector<256x32xf32>
    %c0_i32 = arith.constant 0 : i32
    %c128_i32 = arith.constant 128 : i32
    %3 = arith.muli %c0_i32, %c128_i32 : i32
    %4 = tpu.assume_multiple %3, 128 : i32
    %5 = vector.broadcast %4 : i32 to vector<256x128xi32>
    %6 = arith.addi %1, %5 : vector<256x128xi32>
    %7 = vector.broadcast %0 : vector<256x1xi32> to vector<256x128xi32>
    %8 = arith.cmpi eq, %7, %6 : vector<256x128xi32>
    %9 = arith.extui %8 : vector<256x128xi1> to vector<256x128xi32>
    %10 = arith.sitofp %9 : vector<256x128xi32> to vector<256x128xf32>
    %11 = arith.truncf %10 : vector<256x128xf32> to vector<256x128xbf16>
    %12 = arith.index_cast %4 : i32 to index
    %c0_1 = arith.constant 0 : index
    %13 = vector.load %arg1[%12, %c0_1] : memref<128x32xbf16, #tpu.memory_space<vmem>>, vector<128x32xbf16>
    %cst_2 = arith.constant dense<0.000000e+00> : vector<256x32xf32>
    %14 = tpu.matmul %11, %13, %cst_2 {dimension_numbers = #tpu.dot_dimension_numbers<[1], [0], [0], [1], [0, 0, 1, 1], [], []>} : vector<256x128xbf16>, vector<128x32xbf16>, vector<256x32xf32> -> vector<256x32xf32>
    %15 = arith.addf %2, %14 : vector<256x32xf32>
    %c1_i32 = arith.constant 1 : i32
    %16 = tpu.iota {dimensions = array<i32: 1>} : vector<16x256xi32>
    %17 = tpu.iota {dimensions = array<i32: 0>} : vector<16x256xi32>
    %c16_i32 = arith.constant 16 : i32
    %18 = vector.broadcast %c16_i32 : i32 to vector<16x256xi32>
    %19 = arith.muli %17, %18 : vector<16x256xi32>
    %20 = arith.cmpi sge, %16, %19 : vector<16x256xi32>
    %c16_i32_3 = arith.constant 16 : i32
    %21 = vector.broadcast %c16_i32_3 : i32 to vector<16x256xi32>
    %22 = arith.addi %19, %21 : vector<16x256xi32>
    %23 = arith.cmpi slt, %16, %22 : vector<16x256xi32>
    %24 = arith.andi %20, %23 : vector<16x256xi1>
    %25 = arith.extui %24 : vector<16x256xi1> to vector<16x256xi32>
    %26 = arith.sitofp %25 : vector<16x256xi32> to vector<16x256xf32>
    %27 = arith.truncf %26 : vector<16x256xf32> to vector<16x256xbf16>
    %28 = arith.truncf %15 : vector<256x32xf32> to vector<256x32xbf16>
    %cst_4 = arith.constant dense<0.000000e+00> : vector<16x32xf32>
    %29 = tpu.matmul %27, %28, %cst_4 {dimension_numbers = #tpu.dot_dimension_numbers<[1], [0], [0], [1], [0, 0, 1, 1], [], []>} : vector<16x256xbf16>, vector<256x32xbf16>, vector<16x32xf32> -> vector<16x32xf32>
    %30 = arith.truncf %29 : vector<16x32xf32> to vector<16x32xbf16>
    %c0_5 = arith.constant 0 : index
    %c0_6 = arith.constant 0 : index
    %31 = vector.load %arg2[%c0_5, %c0_6] : memref<32x128xbf16, #tpu.memory_space<vmem>>, vector<32x128xbf16>
    %cst_7 = arith.constant dense<0.000000e+00> : vector<16x128xf32>
    %32 = tpu.matmul %30, %31, %cst_7 {dimension_numbers = #tpu.dot_dimension_numbers<[1], [0], [0], [1], [0, 0, 1, 1], [], []>} : vector<16x32xbf16>, vector<32x128xbf16>, vector<16x128xf32> -> vector<16x128xf32>
    %c0_8 = arith.constant 0 : index
    %c0_9 = arith.constant 0 : index
    %33 = vector.load %arg3[%c0_8, %c0_9] : memref<1x128xf32, #tpu.memory_space<vmem>>, vector<1x128xf32>
    %34 = vector.broadcast %33 : vector<1x128xf32> to vector<16x128xf32>
    %35 = arith.addf %32, %34 : vector<16x128xf32>
    %36 = tpu.iota {dimensions = array<i32: 1>} : vector<16x128xi32>
    %c8_i32 = arith.constant 8 : i32
    %37 = vector.broadcast %c8_i32 : i32 to vector<16x128xi32>
    %38 = arith.cmpi slt, %36, %37 : vector<16x128xi32>
    %cst_10 = arith.constant 0.000000e+00 : f32
    %39 = vector.broadcast %cst_10 : f32 to vector<16x128xf32>
    %40 = arith.select %38, %35, %39 : vector<16x128xi1>, vector<16x128xf32>
    %cst_11 = arith.constant dense<0.000000e+00> : vector<16xf32>
    %41 = vector.multi_reduction <add>, %40, %cst_11 [1] : vector<16x128xf32> to vector<16xf32>
    %42 = vector.shape_cast %41 : vector<16xf32> to vector<16x1xf32>
    %cst_12 = arith.constant 8.000000e+00 : f32
    %43 = vector.broadcast %cst_12 : f32 to vector<16x1xf32>
    %44 = arith.divf %42, %43 : vector<16x1xf32>
    %45 = vector.broadcast %44 : vector<16x1xf32> to vector<16x128xf32>
    %46 = arith.subf %35, %45 : vector<16x128xf32>
    %cst_13 = arith.constant 0.000000e+00 : f32
    %47 = vector.broadcast %cst_13 : f32 to vector<16x128xf32>
    %48 = arith.select %38, %46, %47 : vector<16x128xi1>, vector<16x128xf32>
    %49 = arith.mulf %48, %48 : vector<16x128xf32>
    %cst_14 = arith.constant dense<0.000000e+00> : vector<16xf32>
    %50 = vector.multi_reduction <add>, %49, %cst_14 [1] : vector<16x128xf32> to vector<16xf32>
    %51 = vector.shape_cast %50 : vector<16xf32> to vector<16x1xf32>
    %cst_15 = arith.constant 8.000000e+00 : f32
    %52 = vector.broadcast %cst_15 : f32 to vector<16x1xf32>
    %53 = arith.divf %51, %52 : vector<16x1xf32>
    %54 = vector.broadcast %44 : vector<16x1xf32> to vector<16x128xf32>
    %55 = arith.subf %35, %54 : vector<16x128xf32>
    %cst_16 = arith.constant 9.99999974E-6 : f32
    %56 = vector.broadcast %cst_16 : f32 to vector<16x1xf32>
    %57 = arith.addf %53, %56 : vector<16x1xf32>
    %58 = math.rsqrt %57 : vector<16x1xf32>
    %59 = vector.broadcast %58 : vector<16x1xf32> to vector<16x128xf32>
    %60 = arith.mulf %55, %59 : vector<16x128xf32>
    %c0_17 = arith.constant 0 : index
    %c0_18 = arith.constant 0 : index
    %61 = vector.load %arg4[%c0_17, %c0_18] : memref<1x128xf32, #tpu.memory_space<vmem>>, vector<1x128xf32>
    %62 = vector.broadcast %61 : vector<1x128xf32> to vector<16x128xf32>
    %63 = arith.mulf %60, %62 : vector<16x128xf32>
    %c0_19 = arith.constant 0 : index
    %c0_20 = arith.constant 0 : index
    %64 = vector.load %arg5[%c0_19, %c0_20] : memref<1x128xf32, #tpu.memory_space<vmem>>, vector<1x128xf32>
    %65 = vector.broadcast %64 : vector<1x128xf32> to vector<16x128xf32>
    %66 = arith.addf %63, %65 : vector<16x128xf32>
    %cst_21 = arith.constant -1.000000e+30 : f32
    %67 = vector.broadcast %cst_21 : f32 to vector<16x128xf32>
    %68 = arith.select %38, %66, %67 : vector<16x128xi1>, vector<16x128xf32>
    %cst_22 = arith.constant dense<0xFF800000> : vector<16xf32>
    %69 = vector.multi_reduction <maximumf>, %68, %cst_22 [1] : vector<16x128xf32> to vector<16xf32>
    %70 = vector.shape_cast %69 : vector<16xf32> to vector<16x1xf32>
    %71 = vector.broadcast %70 : vector<16x1xf32> to vector<16x128xf32>
    %72 = arith.cmpf oeq, %68, %71 : vector<16x128xf32>
    %c128_i32_23 = arith.constant 128 : i32
    %73 = vector.broadcast %c128_i32_23 : i32 to vector<16x128xi32>
    %74 = arith.select %72, %36, %73 : vector<16x128xi1>, vector<16x128xi32>
    %cst_24 = arith.constant dense<2147483647> : vector<16xi32>
    %75 = vector.multi_reduction <minsi>, %74, %cst_24 [1] : vector<16x128xi32> to vector<16xi32>
    %76 = vector.shape_cast %75 : vector<16xi32> to vector<16x1xi32>
    %77 = vector.broadcast %70 : vector<16x1xf32> to vector<16x128xf32>
    %78 = arith.subf %68, %77 : vector<16x128xf32>
    %79 = math.exp %78 : vector<16x128xf32>
    %cst_25 = arith.constant dense<0.000000e+00> : vector<16xf32>
    %80 = vector.multi_reduction <add>, %79, %cst_25 [1] : vector<16x128xf32> to vector<16xf32>
    %81 = vector.shape_cast %80 : vector<16xf32> to vector<16x1xf32>
    %82 = math.log %81 : vector<16x1xf32>
    %83 = arith.addf %70, %82 : vector<16x1xf32>
    %c0_26 = arith.constant 0 : index
    %c0_27 = arith.constant 0 : index
    %84 = vector.load %arg6[%c0_26, %c0_27] : memref<16x1xi32, #tpu.memory_space<vmem>>, vector<16x1xi32>
    %85 = vector.broadcast %84 : vector<16x1xi32> to vector<16x128xi32>
    %86 = arith.cmpi eq, %36, %85 : vector<16x128xi32>
    %cst_28 = arith.constant 0.000000e+00 : f32
    %87 = vector.broadcast %cst_28 : f32 to vector<16x128xf32>
    %88 = arith.select %86, %66, %87 : vector<16x128xi1>, vector<16x128xf32>
    %cst_29 = arith.constant dense<0.000000e+00> : vector<16xf32>
    %89 = vector.multi_reduction <add>, %88, %cst_29 [1] : vector<16x128xf32> to vector<16xf32>
    %90 = vector.shape_cast %89 : vector<16xf32> to vector<16x1xf32>
    %91 = arith.subf %83, %90 : vector<16x1xf32>
    %c126_i32 = arith.constant 126 : i32
    %92 = vector.broadcast %c126_i32 : i32 to vector<16x128xi32>
    %93 = arith.cmpi eq, %36, %92 : vector<16x128xi32>
    %94 = arith.sitofp %76 : vector<16x1xi32> to vector<16x1xf32>
    %c127_i32 = arith.constant 127 : i32
    %95 = vector.broadcast %c127_i32 : i32 to vector<16x128xi32>
    %96 = arith.cmpi eq, %36, %95 : vector<16x128xi32>
    %97 = vector.shape_cast %91 : vector<16x1xf32> to vector<16x1xf32>
    %98 = vector.broadcast %97 : vector<16x1xf32> to vector<16x128xf32>
    %99 = arith.select %96, %98, %66 : vector<16x128xi1>, vector<16x128xf32>
    %100 = vector.shape_cast %94 : vector<16x1xf32> to vector<16x1xf32>
    %101 = vector.broadcast %100 : vector<16x1xf32> to vector<16x128xf32>
    %102 = arith.select %93, %101, %99 : vector<16x128xi1>, vector<16x128xf32>
    %c0_30 = arith.constant 0 : index
    %c0_31 = arith.constant 0 : index
    %103 = vector.load %arg7[%c0_30, %c0_31] : memref<16x128xf32, #tpu.memory_space<vmem>>, vector<16x128xf32>
    tpu.vector_store %arg7[%c0_30, %c0_31], %102 {strides = array<i32>} : memref<16x128xf32, #tpu.memory_space<vmem>>, vector<16x128xf32>,
    return
  }
}

</mosaic_0001>

<bundles_post_ra>
// kernel: tpu_custom_call.1
= control target key start
LH: loop header
LB: loop body
LE: loop exit
PB: predicated region body
PF: predicated region fallthrough
CT: control target
= control target key end

     0   :  { %v1043_v2 = vmov 0   ;;  %s1361_s0 = inlined_call_operand.vmem [shape: s32[256,1], index: 0, kind: input, shape index: {}]   ;;  %s1362_s1 = inlined_call_operand.vmem [shape: bf16[128,32], index: 1, kind: input, shape index: {}]   ;;  %s1363_s2 = inlined_call_operand.vmem [shape: bf16[32,128], index: 2, kind: input, shape index: {}]   ;;  %s1364_s3 = inlined_call_operand.vmem [shape: f32[1,128], index: 3, kind: input, shape index: {}]   ;;  %s1365_s4 = inlined_call_operand.vmem [shape: f32[1,128], index: 4, kind: input, shape index: {}]   ;;  %s1366_s5 = inlined_call_operand.vmem [shape: f32[1,128], index: 5, kind: input, shape index: {}]   ;;  %s1367_s6 = inlined_call_operand.vmem [shape: s32[16,1], index: 6, kind: input, shape index: {}]   ;;  %s1368_s7 = inlined_call_operand.hbm [shape: f32[16,128], index: 7, kind: output, shape index: {}]  }
   0x1   :  { %v30_v0 = vld [vmem:[%s1361_s0 + $0x10] sm:$0xff]  ;;  %v28_v1 = vld [vmem:[%s1361_s0] sm:$0xff]  ;;  %996 = vset.pattern.permute.xlu1 %v1043_v2  ;;  %995 = vset.pattern.permute.xlu0 %v1043_v2  ;;  %v31_v3 = vld [vmem:[%s1361_s0 + $0x18] sm:$0xff] }
   0x2   :  { %71 = vperm.xlu1 %996, %v30_v0   ;;  %65 = vperm.xlu0 %995, %v28_v1   ;;  %v29_v4 = vld [vmem:[%s1361_s0 + $0x8] sm:$0xff]  ;;  %v32_v6 = vld [vmem:[%s1361_s0 + $0x20] sm:$0xff]  ;;  %v35_v7 = vld [vmem:[%s1361_s0 + $0x38] sm:$0xff] }
   0x3   :  { %v33_v5 = vld [vmem:[%s1361_s0 + $0x28] sm:$0xff]  ;;  %v34_v8 = vld [vmem:[%s1361_s0 + $0x30] sm:$0xff]  ;;  %v997_v9 = vld [vmem:[%s1362_s1] sm:$0xff]  }
   0x4   :  { %v998_v10 = vld [vmem:[%s1362_s1 + $0x8] sm:$0xff]   ;;  %932 = vmatprep.subr.bf16.mxu0 %v997_v9  ;;  %v36_v12 = vld [vmem:[%s1361_s0 + $0x40] sm:$0xff]  ;;  %v999_v13 = vld [vmem:[%s1362_s1 + $0x10] sm:$0xff]  }
   0x5   :  { %v37_v11 = vld [vmem:[%s1361_s0 + $0x48] sm:$0xff]  ;;  %933 = vmatpush3.bf16.msra.mxu0 %v997_v9  ;;  %v39_v14 = vld [vmem:[%s1361_s0 + $0x58] sm:$0xff]  ;;  %v38_v15 = vld [vmem:[%s1361_s0 + $0x50] sm:$0xff] }
   0x6   :  { %74 = vperm.xlu1 %996, %v31_v3   ;;  %68 = vperm.xlu0 %995, %v29_v4   ;;  %v1000_v16 = vld [vmem:[%s1362_s1 + $0x18] sm:$0xff]  }
   0x7   :  { %934 = vmatprep.subr.bf16.mxu0 %v998_v10 }
   0x9   :  { %935 = vmatpush3.bf16.msra.mxu0 %v998_v10 }
   0xa   :  { %80 = vperm.xlu1 %996, %v33_v5   ;;  %77 = vperm.xlu0 %995, %v32_v6  }
   0xb   :  { %936 = vmatprep.subr.bf16.mxu0 %v999_v13 }
   0xe   :  { %86 = vperm.xlu1 %996, %v35_v7   ;;  %83 = vperm.xlu0 %995, %v34_v8  }
  0x12   :  { %92 = vperm.xlu1 %996, %v37_v11   ;;  %89 = vperm.xlu0 %995, %v36_v12  }
  0x13   :  { %12 = vsyncpa [#allocation3], 0  ;;  %v41_v17 = vld [vmem:[%s1361_s0 + $0x68] sm:$0xff]  ;;  %v40_v18 = vld [vmem:[%s1361_s0 + $0x60] sm:$0xff]  ;;  %937 = vmatpush3.bf16.msra.mxu0 %v999_v13  ;;  %v60_v41 = vlaneseq  ;;  %v1044_v47 = vmov 1.0|1.0  }
  0x14   :  { %938 = vmatprep.subr.bf16.mxu0 %v1000_v16  ;;  %v1001_v19 = vld [vmem:[%s1362_s1 + $0x20] sm:$0xff]   ;;  %v43_v20 = vld [vmem:[%s1361_s0 + $0x78] sm:$0xff]  ;;  %v42_v21 = vld [vmem:[%s1361_s0 + $0x70] sm:$0xff] }
  0x15   :  { %v1002_v22 = vld [vmem:[%s1362_s1 + $0x28] sm:$0xff]   ;;  %v44_v24 = vld [vmem:[%s1361_s0 + $0x80] sm:$0xff]  ;;  %v1003_v25 = vld [vmem:[%s1362_s1 + $0x30] sm:$0xff]   ;;  %v1211_v44 = vand.u32 127, %v60_v41  ;;  %v499_v12 = vshrl.u32 %v60_v41, 7 }
  0x16   :  { %98 = vperm.xlu1 %996, %v39_v14   ;;  %95 = vperm.xlu0 %995, %v38_v15   ;;  %v45_v23 = vld [vmem:[%s1361_s0 + $0x88] sm:$0xff]  ;;  %v47_v26 = vld [vmem:[%s1361_s0 + $0x98] sm:$0xff]  ;;  %v46_v27 = vld [vmem:[%s1361_s0 + $0x90] sm:$0xff] }
  0x17   :  { %939 = vmatpush3.bf16.msra.mxu0 %v1000_v16  ;;  %v1004_v28 = vld [vmem:[%s1362_s1 + $0x38] sm:$0xff]   ;;  %v49_v29 = vld [vmem:[%s1361_s0 + $0xa8] sm:$0xff]  ;;  %v48_v30 = vld [vmem:[%s1361_s0 + $0xa0] sm:$0xff]  ;;  %v500_v13 = vadd.s32 8, %v499_v12  ;;  %v501_v14 = vmul.u32 16, %v499_v12  ;;  %v497_v16 = vadd.s32 128, %v1211_v44 }
  0x18   :  { %940 = vmatprep.subr.bf16.mxu0 %v1001_v19  ;;  %v51_v31 = vld [vmem:[%s1361_s0 + $0xb8] sm:$0xff]  ;;  %v50_v32 = vld [vmem:[%s1361_s0 + $0xb0] sm:$0xff]  ;;  %v53_v33 = vld [vmem:[%s1361_s0 + $0xc8] sm:$0xff] }
  0x19   :  { %v52_v34 = vld [vmem:[%s1361_s0 + $0xc0] sm:$0xff]  ;;  %v55_v35 = vld [vmem:[%s1361_s0 + $0xd8] sm:$0xff]  ;;  %v54_v36 = vld [vmem:[%s1361_s0 + $0xd0] sm:$0xff]  ;;  %v502_v15 = vmul.u32 16, %v500_v13 }
  0x1a   :  { %104 = vperm.xlu1 %996, %v41_v17   ;;  %101 = vperm.xlu0 %995, %v40_v18   ;;  %v57_v37 = vld [vmem:[%s1361_s0 + $0xe8] sm:$0xff]  ;;  %v56_v38 = vld [vmem:[%s1361_s0 + $0xe0] sm:$0xff]  ;;  %v59_v39 = vld [vmem:[%s1361_s0 + $0xf8] sm:$0xff]  ;;  %v507_v17 = vadd.s32 16, %v501_v14 }
  0x1b   :  { %941 = vmatpush3.bf16.msra.mxu0 %v1001_v19  ;;  %v58_v40 = vld [vmem:[%s1361_s0 + $0xf0] sm:$0xff]  ;;  %v508_v18 = vadd.s32 16, %v502_v15 }
  0x1c   :  { %942 = vmatprep.subr.bf16.mxu0 %v1002_v22 }
  0x1e   :  { %110 = vperm.xlu1 %996, %v43_v20   ;;  %107 = vperm.xlu0 %995, %v42_v21  }
  0x1f   :  { %943 = vmatpush3.bf16.msra.mxu0 %v1002_v22 }
  0x20   :  { %944 = vmatprep.subr.bf16.mxu0 %v1003_v25 }
  0x22   :  { %116 = vperm.xlu1 %996, %v45_v23   ;;  %113 = vperm.xlu0 %995, %v44_v24  }
  0x23   :  { %945 = vmatpush3.bf16.msra.mxu0 %v1003_v25 }
  0x24   :  { %946 = vmatprep.subr.bf16.mxu0 %v1004_v28 }
  0x26   :  { %122 = vperm.xlu1 %996, %v47_v26   ;;  %119 = vperm.xlu0 %995, %v46_v27  }
  0x27   :  { %947 = vmatpush3.bf16.msra.mxu0 %v1004_v28 }
  0x2a   :  { %128 = vperm.xlu1 %996, %v49_v29   ;;  %125 = vperm.xlu0 %995, %v48_v30  }
  0x2e   :  { %134 = vperm.xlu1 %996, %v51_v31   ;;  %131 = vperm.xlu0 %995, %v50_v32  }
  0x32   :  { %140 = vperm.xlu1 %996, %v53_v33   ;;  %137 = vperm.xlu0 %995, %v52_v34  }
  0x36   :  { %146 = vperm.xlu1 %996, %v55_v35   ;;  %143 = vperm.xlu0 %995, %v54_v36  }
  0x3a   :  { %152 = vperm.xlu1 %996, %v57_v37   ;;  %149 = vperm.xlu0 %995, %v56_v38  }
  0x3e   :  { %158 = vperm.xlu1 %996, %v59_v39   ;;  %155 = vperm.xlu0 %995, %v58_v40  }
  0x81   :  { %v72_v42 = vpop.permute.xlu1 %71  ;;  %v66_v43 = vpop.permute.xlu0 %65 }
  0x82   :  { %vm162_vm0 = vcmp.eq.s32.totalorder %v72_v42, %v1211_v44  ;;  %vm160_vm3 = vcmp.eq.s32.totalorder %v66_v43, %v1211_v44 }
  0x85   :  { %v75_v45 = vpop.permute.xlu1 %74  ;;  %v69_v46 = vpop.permute.xlu0 %68 }
  0x86   :  { %vm163_vm1 = vcmp.eq.s32.totalorder %v75_v45, %v1211_v44  ;;  %vm161_vm2 = vcmp.eq.s32.totalorder %v69_v46, %v1211_v44 }
  0x87   :  { %vm839_vm4 = vmpackc.low %vm163_vm1, %vm162_vm0 }
  0x88   :  { %vm837_vm5 = vmpackc.low %vm161_vm2, %vm160_vm3 }
  0x89   :  { %948 = vmatprep.mubr.msk.bf16.mxu0 %vm837_vm5, %v1044_v47  ;;  %v81_v48 = vpop.permute.xlu1 %80  ;;  %v78_v49 = vpop.permute.xlu0 %77 }
  0x8a   :  { %vm165_vm6 = vcmp.eq.s32.totalorder %v81_v48, %v1211_v44  ;;  %949 = vmatmul.mubr.msk.bf16.vlgmr.msra.gmra.mrb[0].mxu0 %vm839_vm4, %v1044_v47  ;;  %vm164_vm7 = vcmp.eq.s32.totalorder %v78_v49, %v1211_v44 }
  0x8b   :  { %vm841_vm8 = vmpackc.low %vm165_vm6, %vm164_vm7 }
  0x8c   :  { %952 = vmatprep.mubr.msk.bf16.mxu0 %vm841_vm8, %v1044_v47 }
  0x8d   :  { %v87_v50 = vpop.permute.xlu1 %86  ;;  %v84_v51 = vpop.permute.xlu0 %83 }
  0x8e   :  { %vm167_vm9 = vcmp.eq.s32.totalorder %v87_v50, %v1211_v44  ;;  %vm166_vm10 = vcmp.eq.s32.totalorder %v84_v51, %v1211_v44 }
  0x8f   :  { %vm843_vm11 = vmpackc.low %vm167_vm9, %vm166_vm10 }
  0x91   :  { %v93_v52 = vpop.permute.xlu1 %92  ;;  %v90_v53 = vpop.permute.xlu0 %89 }
  0x92   :  { %vm169_vm12 = vcmp.eq.s32.totalorder %v93_v52, %v1211_v44  ;;  %953 = vmatmul.mubr.msk.bf16.gmra.mrb[4].mxu0 %vm843_vm11, %v1044_v47  ;;  %vm168_vm13 = vcmp.eq.s32.totalorder %v90_v53, %v1211_v44 }
  0x93   :  { %vm845_vm14 = vmpackc.low %vm169_vm12, %vm168_vm13 }
  0x94   :  { %956 = vmatprep.mubr.msk.bf16.mxu0 %vm845_vm14, %v1044_v47 }
  0x95   :  { %v99_v54 = vpop.permute.xlu1 %98  ;;  %v96_v55 = vpop.permute.xlu0 %95 }
  0x96   :  { %vm171_vm15 = vcmp.eq.s32.totalorder %v99_v54, %v1211_v44  ;;  %vm170_vm0 = vcmp.eq.s32.totalorder %v96_v55, %v1211_v44 }
  0x97   :  { %vm847_vm1 = vmpackc.low %vm171_vm15, %vm170_vm0 }
  0x99   :  { %v105_v56 = vpop.permute.xlu1 %104  ;;  %v102_v57 = vpop.permute.xlu0 %101 }
  0x9a   :  { %vm173_vm2 = vcmp.eq.s32.totalorder %v105_v56, %v1211_v44  ;;  %957 = vmatmul.mubr.msk.bf16.gmra.mrb[8].mxu0 %vm847_vm1, %v1044_v47  ;;  %vm172_vm3 = vcmp.eq.s32.totalorder %v102_v57, %v1211_v44 }
  0x9b   :  { %vm849_vm4 = vmpackc.low %vm173_vm2, %vm172_vm3 }
  0x9c   :  { %960 = vmatprep.mubr.msk.bf16.mxu0 %vm849_vm4, %v1044_v47 }
  0x9d   :  { %v111_v58 = vpop.permute.xlu1 %110  ;;  %v108_v59 = vpop.permute.xlu0 %107 }
  0x9e   :  { %vm175_vm5 = vcmp.eq.s32.totalorder %v111_v58, %v1211_v44  ;;  %vm174_vm6 = vcmp.eq.s32.totalorder %v108_v59, %v1211_v44 }
  0x9f   :  { %vm851_vm7 = vmpackc.low %vm175_vm5, %vm174_vm6 }
  0xa1   :  { %v117_v60 = vpop.permute.xlu1 %116  ;;  %v114_v61 = vpop.permute.xlu0 %113 }
  0xa2   :  { %vm177_vm8 = vcmp.eq.s32.totalorder %v117_v60, %v1211_v44  ;;  %961 = vmatmul.mubr.msk.bf16.gmra.mrb[12].mxu0 %vm851_vm7, %v1044_v47  ;;  %vm176_vm9 = vcmp.eq.s32.totalorder %v114_v61, %v1211_v44 }
  0xa3   :  { %vm853_vm10 = vmpackc.low %vm177_vm8, %vm176_vm9 }
  0xa4   :  { %964 = vmatprep.mubr.msk.bf16.mxu0 %vm853_vm10, %v1044_v47 }
  0xa5   :  { %v123_v62 = vpop.permute.xlu1 %122  ;;  %v120_v63 = vpop.permute.xlu0 %119 }
  0xa6   :  { %vm179_vm11 = vcmp.eq.s32.totalorder %v123_v62, %v1211_v44  ;;  %vm178_vm12 = vcmp.eq.s32.totalorder %v120_v63, %v1211_v44 }
  0xa7   :  { %vm855_vm13 = vmpackc.low %vm179_vm11, %vm178_vm12 }
  0xa9   :  { %v129_v0 = vpop.permute.xlu1 %128  ;;  %v126_v1 = vpop.permute.xlu0 %125 }
  0xaa   :  { %vm181_vm14 = vcmp.eq.s32.totalorder %v129_v0, %v1211_v44  ;;  %965 = vmatmul.mubr.msk.bf16.gmra.mrb[16].mxu0 %vm855_vm13, %v1044_v47  ;;  %vm180_vm15 = vcmp.eq.s32.totalorder %v126_v1, %v1211_v44 }
  0xab   :  { %vm857_vm0 = vmpackc.low %vm181_vm14, %vm180_vm15 }
  0xac   :  { %968 = vmatprep.mubr.msk.bf16.mxu0 %vm857_vm0, %v1044_v47  ;;  %vm504_vm0 = vcmp.ge.s32.totalorder %v497_v16, %v501_v14 }
  0xad   :  { %v135_v2 = vpop.permute.xlu1 %134  ;;  %v132_v3 = vpop.permute.xlu0 %131 }
  0xae   :  { %vm183_vm1 = vcmp.eq.s32.totalorder %v135_v2, %v1211_v44  ;;  %vm182_vm2 = vcmp.eq.s32.totalorder %v132_v3, %v1211_v44 }
  0xaf   :  { %vm859_vm3 = vmpackc.low %vm183_vm1, %vm182_vm2  ;;  %vm506_vm1 = vcmp.ge.s32.totalorder %v497_v16, %v502_v15  ;;  %vm510_vm2 = vcmp.lt.s32.totalorder %v497_v16, %v507_v17 }
  0xb1   :  { %v141_v4 = vpop.permute.xlu1 %140  ;;  %v138_v5 = vpop.permute.xlu0 %137 }
  0xb2   :  { %vm185_vm4 = vcmp.eq.s32.totalorder %v141_v4, %v1211_v44  ;;  %969 = vmatmul.mubr.msk.bf16.gmra.mrb[20].mxu0 %vm859_vm3, %v1044_v47  ;;  %vm184_vm5 = vcmp.eq.s32.totalorder %v138_v5, %v1211_v44  ;;  %vm512_vm3 = vcmp.lt.s32.totalorder %v497_v16, %v508_v18  ;;  %v877_v16 = vld [vmem:[%s1364_s3] ss:$0 sm:$0xff] }
  0xb3   :  { %vm861_vm6 = vmpackc.low %vm185_vm4, %vm184_vm5  ;;  %vm503_vm5 = vcmp.ge.s32.totalorder %v1211_v44, %v501_v14 }
  0xb4   :  { %972 = vmatprep.mubr.msk.bf16.mxu0 %vm861_vm6, %v1044_v47  ;;  %vm514_vm4 = vmand %vm504_vm0, %vm510_vm2  ;;  %vm509_vm6 = vcmp.lt.s32.totalorder %v1211_v44, %v507_v17  ;;  %vm653_vm0 = vcmp.lt.s32.totalorder %v1211_v44, 8 }
  0xb5   :  { %v147_v6 = vpop.permute.xlu1 %146  ;;  %v144_v7 = vpop.permute.xlu0 %143 }
  0xb6   :  { %vm187_vm7 = vcmp.eq.s32.totalorder %v147_v6, %v1211_v44  ;;  %vm186_vm8 = vcmp.eq.s32.totalorder %v144_v7, %v1211_v44  ;;  %v1045_v7 = vmov 0.0  }
  0xb7   :  { %vm863_vm9 = vmpackc.low %vm187_vm7, %vm186_vm8  ;;  %vm505_vm8 = vcmp.ge.s32.totalorder %v1211_v44, %v502_v15 }
  0xb8   :  { %vm516_vm7 = vmand %vm506_vm1, %vm512_vm3 }
  0xb9   :  { %v153_v8 = vpop.permute.xlu1 %152  ;;  %v150_v9 = vpop.permute.xlu0 %149 }
  0xba   :  { %vm189_vm10 = vcmp.eq.s32.totalorder %v153_v8, %v1211_v44  ;;  %973 = vmatmul.mubr.msk.bf16.gmra.mrb[24].mxu0 %vm863_vm9, %v1044_v47  ;;  %vm188_vm11 = vcmp.eq.s32.totalorder %v150_v9, %v1211_v44  ;;  %vm511_vm9 = vcmp.lt.s32.totalorder %v1211_v44, %v508_v18  ;;  %v1005_v8 = vld [vmem:[%s1363_s2] sm:$0xff]   ;;  %v1006_v9 = vld [vmem:[%s1363_s2 + $0x8] sm:$0xff]  }
  0xbb   :  { %vm865_vm12 = vmpackc.low %vm189_vm10, %vm188_vm11 }
  0xbc   :  { %976 = vmatprep.mubr.msk.bf16.mxu0 %vm865_vm12, %v1044_v47  ;;  %vm873_vm10 = vmpackc.low %vm516_vm7, %vm514_vm4  ;;  %vm774_vm7 = vcmp.eq.s32.totalorder %v1211_v44, 127 }
  0xbd   :  { %v159_v10 = vpop.permute.xlu1 %158  ;;  %v156_v11 = vpop.permute.xlu0 %155  ;;  %874 = vmatprep.mubr.msk.bf16.mxu1 %vm873_vm10, %v1044_v47  ;;  %vm1268_vm11 = vmand %vm503_vm5, %vm509_vm6 }
  0xbe   :  { %vm191_vm13 = vcmp.eq.s32.totalorder %v159_v10, %v1211_v44  ;;  %vm190_vm14 = vcmp.eq.s32.totalorder %v156_v11, %v1211_v44  ;;  %vm1272_vm12 = vmand %vm505_vm8, %vm511_vm9  ;;  %vm771_vm8 = vcmp.eq.s32.totalorder %v1211_v44, 126 }
  0xbf   :  { %vm867_vm15 = vmpackc.low %vm191_vm13, %vm190_vm14  ;;  %vm1046_vm14 = vmmov 0  }
  0xc0   :  { %vm875_vm13 = vmpackc.low %vm1272_vm12, %vm1268_vm11 }
  0xc2   :  { %977 = vmatmul.mubr.msk.bf16.gmra.mrb[28].mxu0 %vm867_vm15, %v1044_v47  ;;  %vm608_vm15 = vcmask 261120  }
 0x15d   :  { %v950_v21 = vpop.f32.mrb[0].mxu0 }
 0x15e   :  { %v370_v22 = vpop.f32.mrb[1].mxu0 }
 0x15f   :  { %v951_v23 = vpop.f32.mrb[2].mxu0 }
 0x160   :  { %v528_v24 = vpack.c.bf16 %v951_v23, %v950_v21  ;;  %v373_v25 = vpop.f32.mrb[3].mxu0 }
 0x161   :  { %v527_v26 = vpack.c.bf16 %v373_v25, %v370_v22 }
 0x165   :  { %v954_v27 = vpop.f32.mrb[4].mxu0 }
 0x166   :  { %v386_v28 = vpop.f32.mrb[5].mxu0 }
 0x167   :  { %v955_v29 = vpop.f32.mrb[6].mxu0 }
 0x168   :  { %v530_v30 = vpack.c.bf16 %v955_v29, %v954_v27  ;;  %v389_v31 = vpop.f32.mrb[7].mxu0 }
 0x169   :  { %v529_v32 = vpack.c.bf16 %v389_v31, %v386_v28 }
 0x16d   :  { %v958_v33 = vpop.f32.mrb[8].mxu0 }
 0x16e   :  { %v402_v34 = vpop.f32.mrb[9].mxu0 }
 0x16f   :  { %v959_v35 = vpop.f32.mrb[10].mxu0 }
 0x170   :  { %v532_v36 = vpack.c.bf16 %v959_v35, %v958_v33  ;;  %v405_v37 = vpop.f32.mrb[11].mxu0 }
 0x171   :  { %v531_v38 = vpack.c.bf16 %v405_v37, %v402_v34 }
 0x175   :  { %v962_v39 = vpop.f32.mrb[12].mxu0 }
 0x176   :  { %v418_v40 = vpop.f32.mrb[13].mxu0 }
 0x177   :  { %v963_v41 = vpop.f32.mrb[14].mxu0 }
 0x178   :  { %v534_v42 = vpack.c.bf16 %v963_v41, %v962_v39  ;;  %v421_v43 = vpop.f32.mrb[15].mxu0 }
 0x179   :  { %v533_v45 = vpack.c.bf16 %v421_v43, %v418_v40 }
 0x17d   :  { %v966_v46 = vpop.f32.mrb[16].mxu0 }
 0x17e   :  { %v434_v48 = vpop.f32.mrb[17].mxu0 }
 0x17f   :  { %v967_v49 = vpop.f32.mrb[18].mxu0 }
 0x180   :  { %v536_v50 = vpack.c.bf16 %v967_v49, %v966_v46  ;;  %v437_v51 = vpop.f32.mrb[19].mxu0 }
 0x181   :  { %v535_v52 = vpack.c.bf16 %v437_v51, %v434_v48 }
 0x183   :  { %907 = vmatprep.subr.bf16.mxu1 %v535_v52 }
 0x184   :  { %908 = vmatpush3.bf16.msra.mxu1 %v527_v26 }
 0x185   :  { %v970_v53 = vpop.f32.mrb[20].mxu0  ;;  %909 = vmatprep.subr.bf16.mxu1 %v536_v50 }
 0x186   :  { %v450_v54 = vpop.f32.mrb[21].mxu0 }
 0x187   :  { %v971_v55 = vpop.f32.mrb[22].mxu0 }
 0x188   :  { %v538_v56 = vpack.c.bf16 %v971_v55, %v970_v53  ;;  %v453_v57 = vpop.f32.mrb[23].mxu0  ;;  %910 = vmatpush3.bf16.msra.mxu1 %v528_v24 }
 0x189   :  { %v537_v58 = vpack.c.bf16 %v453_v57, %v450_v54 }
 0x18b   :  { %911 = vmatprep.subr.bf16.mxu1 %v537_v58 }
 0x18c   :  { %912 = vmatpush3.bf16.msra.mxu1 %v529_v32 }
 0x18d   :  { %v974_v59 = vpop.f32.mrb[24].mxu0  ;;  %913 = vmatprep.subr.bf16.mxu1 %v538_v56 }
 0x18e   :  { %v466_v60 = vpop.f32.mrb[25].mxu0 }
 0x18f   :  { %v975_v61 = vpop.f32.mrb[26].mxu0 }
 0x190   :  { %v540_v62 = vpack.c.bf16 %v975_v61, %v974_v59  ;;  %v469_v63 = vpop.f32.mrb[27].mxu0  ;;  %914 = vmatpush3.bf16.msra.mxu1 %v530_v30 }
 0x191   :  { %v539_v0 = vpack.c.bf16 %v469_v63, %v466_v60  ;;  %v753_v63 = vld [vmem:[%s1367_s6] sm:$0xff] }
 0x193   :  { %915 = vmatprep.subr.bf16.mxu1 %v539_v0  ;;  %v754_v0 = vld [vmem:[%s1367_s6 + $0x8] sm:$0xff]  ;;  %s1047_s6 = smov [#allocation2]  }
 0x194   :  { %916 = vmatpush3.bf16.msra.mxu1 %v531_v38  ;;  %s786_s19 = sshll.u32 %s1047_s6, 4  ;;  %s787_s19 = int_to_ptr.vmem [resolvable:$true] %s786_s19 }
 0x195   :  { %v978_v1 = vpop.f32.mrb[28].mxu0  ;;  %917 = vmatprep.subr.bf16.mxu1 %v540_v62  ;;  %s1019_s20 = scalar_lea.vmem %s787_s19, 256  ;;  %p1024_p1 = scmp.lt.s32.totalorder %s787_s19, %s787_s19 }
 0x196   :  { %v482_v2 = vpop.f32.mrb[29].mxu0  ;;  %p1020_p0 = scmp.ne.s32.totalorder %s787_s19, %s1019_s20  ;;  %p1025_p2 = scmp.lt.s32.totalorder %s1019_s20, %s1019_s20 }
 0x197   :  { %v979_v3 = vpop.f32.mrb[30].mxu0 }
 0x198   :  { %v542_v4 = vpack.c.bf16 %v979_v3, %v978_v1  ;;  %v485_v5 = vpop.f32.mrb[31].mxu0  ;;  %918 = vmatpush3.bf16.msra.mxu1 %v532_v36  ;;  %p1026_p3 = por %p1025_p2, %p1024_p1 }
 0x199   :  { %v541_v6 = vpack.c.bf16 %v485_v5, %v482_v2 }
 0x19a   :  { %p1027_p4 = pnand %p1026_p3, %p1020_p0 }
 0x19b   :  { %919 = vmatprep.subr.bf16.mxu1 %v541_v6 }
 0x19c   :  { %920 = vmatpush3.bf16.msra.mxu1 %v533_v45  ;;  %v882_v45 = vld [vmem:[%s1366_s5] ss:$0 sm:$0xff] }
 0x19d   :  { %921 = vmatprep.subr.bf16.mxu1 %v542_v4 }
 0x1a0   :  { %922 = vmatpush3.bf16.msra.mxu1 %v534_v42  ;;  %v881_v42 = vld [vmem:[%s1365_s4] ss:$0 sm:$0xff] }
 0x1a1   :  { %980 = vmatprep.subr.bf16.mxu1 %v1045_v7 }
 0x1a3   :  { %876 = vmatmul.mubr.msk.bf16.vlgmr.msra.gmra.mrb[0].mxu1 %vm875_vm13, %v1044_v47 }
 0x1a4   :  { %981 = vmatpush3.bf16.msra.mxu1 %v1005_v8  ;;  %984 = vmatprep.mubr.msk.bf16.mxu1 %vm1046_vm14, %v1045_v7 }
 0x1a5   :  { %982 = vmatprep.subr.bf16.mxu1 %v1045_v7 }
 0x1a8   :  { %983 = vmatpush3.bf16.msra.mxu1 %v1006_v9 }
 0x276   :  { %v923_v10 = vpop.f32.mrb[0].mxu1 }
 0x277   :  { %v924_v11 = vpop.f32.mrb[1].mxu1 }
 0x278   :  { %v925_v12 = vadd.f32 %v924_v11, %v923_v10  ;;  %v926_v13 = vpop.f32.mrb[2].mxu1 }
 0x279   :  { %v927_v14 = vpop.f32.mrb[3].mxu1 }
 0x27a   :  { %v928_v15 = vadd.f32 %v927_v14, %v926_v13 }
 0x27c   :  { %v584_v47 = vpack.c.bf16 %v928_v15, %v925_v12 }
 0x27e   :  { %985 = vmatmul.mubr.msk.bf16.vlgmr.msra.gmra.mrb[4].mxu1 %vm608_vm15, %v584_v47 }
 0x351   :  { %v646_v17 = vpop.f32.mrb[4].mxu1 }
 0x352   :  { %v647_v18 = vadd.f32 %v877_v16, %v646_v17  ;;  %v986_v19 = vpop.f32.mrb[5].mxu1 }
 0x353   :  { %v649_v20 = vpop.f32.mrb[6].mxu1 }
 0x354   :  { %v650_v21 = vadd.f32 %v877_v16, %v649_v20  ;;  %v987_v22 = vpop.f32.mrb[7].mxu1  ;;  %v654_v23 = vsel %vm653_vm0, %v647_v18, 0.0 }
 0x355   :  { %656 = vadd.xlane.f32.xlu0 %v654_v23 }
 0x356   :  { %v655_v24 = vsel %vm653_vm0, %v650_v21, 0.0 }
 0x357   :  { %658 = vadd.xlane.f32.xlu1 %v655_v24 }
 0x3e2   :  { %v657_v25 = vpop.xlane.xlu0 %656 }
 0x3e3   :  { %v661_v26 = vmul.f32 0.125, %v657_v25 }
 0x3e4   :  { %v659_v27 = vpop.xlane.xlu1 %658 }
 0x3e5   :  { %v663_v28 = vsub.f32 %v647_v18, %v661_v26  ;;  %v662_v29 = vmul.f32 0.125, %v659_v27 }
 0x3e7   :  { %v664_v30 = vsub.f32 %v650_v21, %v662_v29  ;;  %v665_v31 = vsel %vm653_vm0, %v663_v28, 0.0 }
 0x3e8   :  { %v667_v32 = vmul.f32 %v665_v31, %v665_v31 }
 0x3e9   :  { %v666_v33 = vsel %vm653_vm0, %v664_v30, 0.0 }
 0x3ea   :  { %669 = vadd.xlane.f32.xlu0 %v667_v32  ;;  %v668_v34 = vmul.f32 %v666_v33, %v666_v33 }
 0x3ee   :  { %671 = vadd.xlane.f32.xlu0 %v668_v34 }
 0x477   :  { %v670_v35 = vpop.xlane.xlu0 %669 }
 0x478   :  { %v673_v36 = vmul.f32 0.125, %v670_v35 }
 0x47a   :  { %v675_v37 = vadd.f32 1e-05, %v673_v36 }
 0x47b   :  { %v672_v38 = vpop.xlane.xlu0 %671 }
 0x47c   :  { %1007 = vrsqrt.f32 %v675_v37  ;;  %v674_v39 = vmul.f32 0.125, %v672_v38 }
 0x47e   :  { %v676_v40 = vadd.f32 1e-05, %v674_v39 }
 0x480   :  { %1009 = vrsqrt.f32 %v676_v40 }
 0x486   :  { %v1008_v41 = vpop.eup %1007 }
 0x487   :  { %v679_v43 = vmul.f32 %v1008_v41, %v663_v28 }
 0x489   :  { %v688_v46 = vmul.f32 %v881_v42, %v679_v43 }
 0x48a   :  { %v1010_v48 = vpop.eup %1009 }
 0x48b   :  { %v1310_v49 = vadd.f32 %v882_v45, %v688_v46  ;;  %v680_v50 = vmul.f32 %v1010_v48, %v664_v30 }
 0x48d   :  { %v699_v51 = vsel %vm653_vm0, %v1310_v49, -1e+30  ;;  %v689_v52 = vmul.f32 %v881_v42, %v680_v50 }
 0x48e   :  { %701 = vmax.xlane.f32.xlu1 %v699_v51 }
 0x48f   :  { %v1315_v53 = vadd.f32 %v882_v45, %v689_v52 }
 0x491   :  { %v700_v54 = vsel %vm653_vm0, %v1315_v53, -1e+30 }
 0x492   :  { %703 = vmax.xlane.f32.xlu0 %v700_v54 }
 0x51b   :  { %v702_v55 = vpop.xlane.xlu1 %701 }
 0x51c   :  { %vm705_vm1 = vcmp.eq.f32.partialorder %v699_v51, %v702_v55  ;;  %v737_v1 = vsub.f32 %v699_v51, %v702_v55 }
 0x51d   :  { %v707_v56 = vsel %vm705_vm1, %v1211_v44, 128 }
 0x51e   :  { %v710_v57 = vshra.s32 %v707_v56, 16  ;;  %v739_v2 = vmul.f32 1.442695, %v737_v1  ;;  %v709_v7 = vand.u32 65535, %v707_v56 }
 0x51f   :  { %v1321_v58 = vpop.xlane.xlu0 %703 }
 0x520   :  { %vm706_vm2 = vcmp.eq.f32.partialorder %v700_v54, %v1321_v58  ;;  %v712_v59 = vcvt.s32.f32 %v710_v57  ;;  %v738_v3 = vsub.f32 %v700_v54, %v1321_v58  ;;  %1011 = vpow2.f32 %v739_v2 }
 0x521   :  { %v708_v60 = vsel %vm706_vm2, %v1211_v44, 128  ;;  %v711_v9 = vcvt.s32.f32 %v709_v7 }
 0x522   :  { %713 = vmin.xlane.f32.xlu1 %v712_v59  ;;  %v724_v61 = vshra.s32 %v708_v60, 16  ;;  %v741_v4 = vmul.f32 1.442695, %v738_v3  ;;  %v723_v10 = vand.u32 65535, %v708_v60 }
 0x524   :  { %v726_v62 = vcvt.s32.f32 %v724_v61  ;;  %1013 = vpow2.f32 %v741_v4  ;;  %v725_v14 = vcvt.s32.f32 %v723_v10 }
 0x526   :  { %727 = vmin.xlane.f32.xlu0 %v726_v62 }
 0x52a   :  { %v1012_v5 = vpop.eup %1011 }
 0x52e   :  { %v1014_v6 = vpop.eup %1013 }
 0x533   :  { %756 = vperm.xlu1 %996, %v753_v63  }
 0x53c   :  { %759 = vperm.xlu0 %995, %v754_v0  }
 0x557   :  { %743 = vadd.xlane.f32.xlu1 %v1012_v5 }
 0x55b   :  { %745 = vadd.xlane.f32.xlu0 %v1014_v6 }
 0x5af   :  { %v714_v8 = vpop.xlane.xlu1 %713 }
 0x5b0   :  { %vm715_vm3 = vcmp.eq.f32.partialorder %v712_v59, %v714_v8  ;;  %v720_v21 = vcvt.f32.s32 %v714_v8 }
 0x5b1   :  { %v716_v11 = vsel %vm715_vm3, %v711_v9, inf }
 0x5b2   :  { %717 = vmin.xlane.f32.xlu1 %v716_v11  ;;  %v721_v24 = vshll.u32 %v720_v21, 16 }
 0x5b3   :  { %v728_v12 = vpop.xlane.xlu0 %727  ;;  %v757_v13 = vpop.permute.xlu1 %756 }
 0x5b4   :  { %vm761_vm4 = vcmp.eq.s32.totalorder %v1211_v44, %v757_v13  ;;  %vm729_vm5 = vcmp.eq.f32.partialorder %v726_v62, %v728_v12  ;;  %v734_v29 = vcvt.f32.s32 %v728_v12 }
 0x5b5   :  { %v730_v15 = vsel %vm729_vm5, %v725_v14, inf  ;;  %v763_v47 = vsel %vm761_vm4, %v1310_v49, 0.0 }
 0x5b6   :  { %731 = vmin.xlane.f32.xlu0 %v730_v15  ;;  %765 = vadd.xlane.f32.xlu1 %v763_v47  ;;  %v735_v37 = vshll.u32 %v734_v29, 16 }
 0x5bb   :  { %v760_v16 = vpop.permute.xlu0 %759 }
 0x5bc   :  { %vm762_vm6 = vcmp.eq.s32.totalorder %v1211_v44, %v760_v16 }
 0x5bd   :  { %v764_v17 = vsel %vm762_vm6, %v1315_v53, 0.0 }
 0x5be   :  { %767 = vadd.xlane.f32.xlu0 %v764_v17 }
 0x5e4   :  { %v744_v18 = vpop.xlane.xlu1 %743 }
 0x5e5   :  { %1015 = vlog2.f32 %v744_v18 }
 0x5e8   :  { %v746_v19 = vpop.xlane.xlu0 %745 }
 0x5e9   :  { %1017 = vlog2.f32 %v746_v19 }
 0x5ef   :  { %v1016_v20 = vpop.eup %1015 }
 0x5f0   :  { %v748_v22 = vmul.f32 0.6931472, %v1016_v20 }
 0x5f2   :  { %v751_v27 = vadd.f32 %v748_v22, %v702_v55 }
 0x5f3   :  { %v1018_v28 = vpop.eup %1017 }
 0x5f4   :  { %v750_v35 = vmul.f32 0.6931472, %v1018_v28 }
 0x5f6   :  { %v752_v40 = vadd.f32 %v750_v35, %v1321_v58 }
 0x63f   :  { %v718_v23 = vpop.xlane.xlu1 %717 }
 0x640   :  { %v719_v25 = vcvt.f32.s32 %v718_v23 }
 0x642   :  { %v722_v26 = vadd.s32 %v721_v24, %v719_v25 }
 0x643   :  { %v732_v30 = vpop.xlane.xlu0 %731  ;;  %v766_v31 = vpop.xlane.xlu1 %765 }
 0x644   :  { %v772_v32 = vcvt.s32.f32 %v722_v26  ;;  %v769_v33 = vsub.f32 %v751_v27, %v766_v31  ;;  %v733_v34 = vcvt.f32.s32 %v732_v30 }
 0x646   :  { %v775_v36 = vsel %vm774_vm7, %v769_v33, %v1310_v49  ;;  %v736_v39 = vadd.s32 %v735_v37, %v733_v34 }
 0x647   :  { %v777_v38 = vsel %vm771_vm8, %v772_v32, %v775_v36 }
 0x648   :  { %779 = vst [vmem:[#allocation2] sm:$0xff] %v777_v38  ;;  %v773_v43 = vcvt.s32.f32 %v736_v39 }
 0x64b   :  { %v768_v41 = vpop.xlane.xlu0 %767 }
 0x64c   :  { %v770_v42 = vsub.f32 %v752_v40, %v768_v41 }
 0x64e   :  { %v776_v45 = vsel %vm774_vm7, %v770_v42, %v1315_v53 }
 0x64f   :  { %v778_v46 = vsel %vm771_vm8, %v773_v43, %v776_v45 }
 0x650   :  { %780 = vst [vmem:[#allocation2 + $0x8] sm:$0xff] %v778_v46 }
 0x651   :  { %1030 = shalt.err (!%p1027_p4)
}
 0x652   :  { %s1031_s23 = scalar_lea.hbm %s1368_s7, 256 }
 0x653   :  { %p1032_p5 = scmp.ne.s32.totalorder %s1368_s7, %s1031_s23  ;;  %p1035_p6 = scmp.lt.u32.totalorder %s1031_s23, %s1368_s7 }
 0x655   :  { %p1037_p7 = pnand %p1035_p6, %p1032_p5 }
 0x657   :  { %1040 = shalt.err (!%p1037_p7)
}
 0x658   :  { %s1048_s28 = smov 128   ;;  %s1049_s29 = smov 8  }
 0x659   :  { %792 = dma.vmem_to_hbm [thread:$0]  %s787_s19, 256, %s1368_s7, [#allocation3], %s1048_s28, %s1048_s28, %s1049_s29  }
 0x65a   :  { %1041 = dma.done.wait [#allocation3], 256  }
 0x65b   :  { %1042 = vsyncadd [#allocation3], 4294967040 }
 0x65c   :  { %796 = vsyncpa [#allocation3], 1 }

</bundles_post_ra>
